<compile_context>
chip_gen: v6e
topology: v6e:2x2x1
jax: 0.10.0
libtpu: 0.0.40
codegen_flags: <defaults>
</compile_context>

<pallas_src>
import functools

import jax
import jax.numpy as jnp
from jax.experimental import pallas as pl
from jax.experimental.pallas import tpu as pltpu


def _lstm_kernel(x_ref, h0_ref, c0_ref, wih_ref, whh_ref, b_ref, wfc_ref,
                 bfc_ref, out_ref, hn_ref, cn_ref, h_scr, c_scr, xg_scr,
                 *, t_real, t_pad):
    c_idx = pl.program_id(1)          # time-chunk index (inner, "arbitrary")
    chunk, b_tile, in_dim = x_ref.shape
    H = h_scr.shape[-1]
    needs_mask = (t_pad != t_real)    # static Python bool

    # Initialize the recurrent carry from (h0, c0) on the first time chunk of
    # each batch tile.
    @pl.when(c_idx == 0)
    def _():
        h_scr[...] = h0_ref[...]
        c_scr[...] = c0_ref[...]

    # Chunk-level input projection: one large MXU matmul (M = chunk * B_tile),
    # bias folded in and hoisted out of the recurrent loop.  Stored in the
    # compute dtype (bf16 on the bf16 path) to halve the dominant scratch.
    x2d = x_ref[...].reshape(chunk * b_tile, in_dim)
    xg = (jnp.dot(x2d, wih_ref[...], preferred_element_type=jnp.float32)
          + b_ref[...])
    xg_scr[...] = xg.reshape(chunk, b_tile, 4 * H).astype(xg_scr.dtype)

    whh = whh_ref[...]  # resident recurrent weight, hoisted load

    def step(t, carry):
        # h, c stay in vregs (f32) across steps within the chunk.
        h, c = carry
        gates = (xg_scr[t].astype(jnp.float32)
                 + jnp.dot(h.astype(whh.dtype), whh,
                           preferred_element_type=jnp.float32))
        # Gate order after host-side column permute: [i, f, o, g] so a single
        # wide sigmoid covers i/f/o and a single tanh covers g.
        sig = jax.nn.sigmoid(gates[:, :3 * H])
        g_g = jnp.tanh(gates[:, 3 * H:])
        i_g = sig[:, 0 * H:1 * H]
        f_g = sig[:, 1 * H:2 * H]
        o_g = sig[:, 2 * H:3 * H]
        c_new = f_g * c + i_g * g_g
        h_new = o_g * jnp.tanh(c_new)
        if needs_mask:
            # Padded timesteps (beyond the real T) must NOT update the state:
            # a zero input would still move h/c through the bias.
            upd = (c_idx * chunk + t) < t_real
            h_new = jnp.where(upd, h_new, h)
            c_new = jnp.where(upd, c_new, c)
        return (h_new, c_new)

    h_fin, c_fin = jax.lax.fori_loop(
        0, chunk, step, (h_scr[...], c_scr[...]), unroll=min(chunk, 8))

    # Persist the carry for the next chunk.
    h_scr[...] = h_fin
    c_scr[...] = c_fin

    # On the last chunk: emit h_n, c_n and the fused Linear head on h_n.
    @pl.when(c_idx == pl.num_programs(1) - 1)
    def _():
        hn_ref[...] = h_fin
        cn_ref[...] = c_fin
        out_ref[...] = (jnp.dot(h_fin.astype(wfc_ref.dtype), wfc_ref[...],
                                preferred_element_type=jnp.float32)
                        + bfc_ref[...])


# Explicit-buffer budget that fits every chip generation (v7x has 64 MiB/TC).
_VMEM_BUDGET_BYTES = 40 * 1024 * 1024
_VMEM_LIMIT_BYTES = 64 * 1024 * 1024


def _pick_chunk(T, b_tile, in_dim, H, out_dim, x_itemsize, xg_itemsize,
                budget_bytes=_VMEM_BUDGET_BYTES):
    """Largest time chunk whose VMEM working set fits the budget."""
    four_h = 4 * H
    # Chunk-independent VMEM: weight/bias blocks (x2: default double-buffered
    # pipelined inputs), h0/c0 input blocks (x2), h/c carry scratch, outputs.
    fixed = 2 * x_itemsize * (in_dim * four_h + H * four_h + H * out_dim)
    fixed += 2 * 4 * (four_h + out_dim)                    # biases (f32)
    fixed += 2 * 4 * (2 * b_tile * H)                      # h0/c0 blocks
    fixed += 4 * (2 * b_tile * H)                          # h/c carry scratch
    fixed += 2 * 4 * (b_tile * out_dim + 2 * b_tile * H)   # output blocks
    avail = budget_bytes - fixed
    # Per-timestep VMEM: one xg_scr row + double-buffered x block row.
    per_step = b_tile * four_h * xg_itemsize + 2 * b_tile * in_dim * x_itemsize
    chunk = avail // per_step if per_step > 0 else T
    return int(max(1, min(T, chunk)))


@functools.partial(jax.jit, static_argnames=("compute_dtype", "max_chunk"))
def simple_lstm_forward(x, h0, c0, w_ih, w_hh, b_ih, b_hh, w_fc, b_fc,
                        *, compute_dtype=jnp.float32, max_chunk=None):
    """Mirrors SimpleLSTM.forward for n_layers == 1, drop_prob == 0.

    x: (T, B, I); h0/c0: (1, B, H); w_ih: (4H, I); w_hh: (4H, H);
    b_ih/b_hh: (4H,); w_fc: (O, H); b_fc: (O,)
    returns (out (B, O), (h_n (1, B, H), c_n (1, B, H)))
    """
    T, B, I = x.shape
    H = w_hh.shape[1]
    O = w_fc.shape[0]

    cdt = jnp.dtype(compute_dtype)
    xg_dtype = jnp.float32 if cdt == jnp.dtype(jnp.float32) else cdt

    # Sublane-friendly batch padding + a batch-tile axis (2 tiles when it
    # splits cleanly into multiples of 8) for megacore "parallel" sharding.
    B_pad = max(8, ((B + 7) // 8) * 8)
    n_btiles = 2 if (B_pad % 16 == 0) else 1
    B_tile = B_pad // n_btiles

    # VMEM-budget-driven time chunk; T is padded up to a chunk multiple and
    # padded steps are masked inside the kernel.
    chunk = _pick_chunk(T, B_tile, I, H, O,
                        x_itemsize=cdt.itemsize,
                        xg_itemsize=jnp.dtype(xg_dtype).itemsize)
    if max_chunk is not None:
        chunk = max(1, min(chunk, int(max_chunk)))
    n_chunks = (T + chunk - 1) // chunk
    T_pad = n_chunks * chunk

    # Permute gate columns PyTorch [i, f, g, o] -> [i, f, o, g] so the kernel
    # applies one wide sigmoid (3H) and one tanh (H) per step.
    idx = jnp.arange(H)
    perm = jnp.concatenate([idx, H + idx, 3 * H + idx, 2 * H + idx])

    # Pre-transpose weights so the kernel does plain (M,*)x(*,N) matmuls; fold
    # the two biases together; optionally cast matmul operands to bf16 while
    # keeping f32 accumulation + f32 elementwise/state math.
    wih_t = w_ih[perm].T.astype(cdt)                     # (I, 4H)
    whh_t = w_hh[perm].T.astype(cdt)                     # (H, 4H)
    b = (b_ih + b_hh)[perm].reshape(1, 4 * H).astype(jnp.float32)
    wfc_t = w_fc.T.astype(cdt)                           # (H, O)
    bfc = b_fc.reshape(1, O).astype(jnp.float32)

    xp = jnp.pad(x, ((0, T_pad - T), (0, B_pad - B), (0, 0))).astype(cdt)
    h0p = jnp.pad(h0.reshape(B, H), ((0, B_pad - B), (0, 0))).astype(jnp.float32)
    c0p = jnp.pad(c0.reshape(B, H), ((0, B_pad - B), (0, 0))).astype(jnp.float32)

    const2 = lambda bi, ci: (0, 0)
    btile2 = lambda bi, ci: (bi, 0)

    kernel = functools.partial(_lstm_kernel, t_real=T, t_pad=T_pad)

    out, h_n, c_n = pl.pallas_call(
        kernel,
        out_shape=(
            jax.ShapeDtypeStruct((B_pad, O), jnp.float32),
            jax.ShapeDtypeStruct((B_pad, H), jnp.float32),
            jax.ShapeDtypeStruct((B_pad, H), jnp.float32),
        ),
        grid_spec=pltpu.PrefetchScalarGridSpec(
            num_scalar_prefetch=0,
            grid=(n_btiles, n_chunks),
            in_specs=[
                pl.BlockSpec((chunk, B_tile, I), lambda bi, ci: (ci, bi, 0)),
                pl.BlockSpec((B_tile, H), btile2),                 # h0
                pl.BlockSpec((B_tile, H), btile2),                 # c0
                pl.BlockSpec((I, 4 * H), const2),                  # W_ih^T
                pl.BlockSpec((H, 4 * H), const2),                  # W_hh^T
                pl.BlockSpec((1, 4 * H), const2),                  # bias
                pl.BlockSpec((H, O), const2),                      # W_fc^T
                pl.BlockSpec((1, O), const2),                      # b_fc
            ],
            out_specs=[
                pl.BlockSpec((B_tile, O), btile2),
                pl.BlockSpec((B_tile, H), btile2),
                pl.BlockSpec((B_tile, H), btile2),
            ],
            scratch_shapes=[
                pltpu.VMEM((B_tile, H), jnp.float32),              # h carry
                pltpu.VMEM((B_tile, H), jnp.float32),              # c carry
                pltpu.VMEM((chunk, B_tile, 4 * H), xg_dtype),      # x projection
            ],
        ),
        compiler_params=pltpu.CompilerParams(
            dimension_semantics=("parallel", "arbitrary"),
            vmem_limit_bytes=_VMEM_LIMIT_BYTES),
    )(xp, h0p, c0p, wih_t, whh_t, b, wfc_t, bfc)

    out = out[:B]
    h_n = h_n[:B].reshape(1, B, H)
    c_n = c_n[:B].reshape(1, B, H)
    return out, (h_n, c_n)


def _reference_forward(x, h0, c0, w_ih, w_hh, b_ih, b_hh, w_fc, b_fc):
    """Pure-JAX reference (lax.scan) for correctness checking."""
    H = w_hh.shape[1]
    h = h0[0]
    c = c0[0]

    def step(carry, x_t):
        h, c = carry
        gates = x_t @ w_ih.T + h @ w_hh.T + b_ih + b_hh
        i = jax.nn.sigmoid(gates[:, 0 * H:1 * H])
        f = jax.nn.sigmoid(gates[:, 1 * H:2 * H])
        g = jnp.tanh(gates[:, 2 * H:3 * H])
        o = jax.nn.sigmoid(gates[:, 3 * H:4 * H])
        c = f * c + i * g
        h = o * jnp.tanh(c)
        return (h, c), h

    (h, c), _ = jax.lax.scan(step, (h, c), x)
    out = h @ w_fc.T + b_fc
    return out, (h[None], c[None])


if __name__ == "__main__":
    # n_layers must be 1 (view constraint in forward), drop_prob = 0.0.
    seq_len, batch, input_size, hidden_dim, output_size = 8, 2, 16, 32, 8

    key = jax.random.PRNGKey(0)
    keys = jax.random.split(key, 10)
    bound = 1.0 / jnp.sqrt(hidden_dim)  # PyTorch-style uniform init range

    w_ih = jax.random.uniform(keys[0], (4 * hidden_dim, input_size),
                              jnp.float32, -bound, bound)
    w_hh = jax.random.uniform(keys[1], (4 * hidden_dim, hidden_dim),
                              jnp.float32, -bound, bound)
    b_ih = jax.random.uniform(keys[2], (4 * hidden_dim,), jnp.float32, -bound, bound)
    b_hh = jax.random.uniform(keys[3], (4 * hidden_dim,), jnp.float32, -bound, bound)
    w_fc = jax.random.uniform(keys[4], (output_size, hidden_dim),
                              jnp.float32, -bound, bound)
    b_fc = jax.random.uniform(keys[5], (output_size,), jnp.float32, -bound, bound)

    x = jax.random.normal(keys[6], (seq_len, batch, input_size), jnp.float32)
    # init_hidden: zeros (double in PyTorch; float32 here to match the params)
    h0 = jnp.zeros((1, batch, hidden_dim), jnp.float32)
    c0 = jnp.zeros((1, batch, hidden_dim), jnp.float32)

    out_ref, (h_ref, c_ref) = _reference_forward(x, h0, c0, w_ih, w_hh,
                                                 b_ih, b_hh, w_fc, b_fc)

    # 1) f32 path: exact match with the reference.
    out, (h_n, c_n) = simple_lstm_forward(x, h0, c0, w_ih, w_hh, b_ih, b_hh,
                                          w_fc, b_fc,
                                          compute_dtype=jnp.float32)
    jax.block_until_ready(out)
    assert jnp.allclose(out, out_ref, atol=1e-5, rtol=1e-5)
    assert jnp.allclose(h_n, h_ref, atol=1e-5, rtol=1e-5)
    assert jnp.allclose(c_n, c_ref, atol=1e-5, rtol=1e-5)

    # 2) bf16-operand path (MXU-native on v6e/v7x): looser tolerance vs f32 ref.
    out_bf, (h_bf, c_bf) = simple_lstm_forward(x, h0, c0, w_ih, w_hh, b_ih,
                                               b_hh, w_fc, b_fc,
                                               compute_dtype=jnp.bfloat16)
    jax.block_until_ready(out_bf)
    assert jnp.allclose(out_bf, out_ref, atol=5e-2, rtol=5e-2)
    assert jnp.allclose(h_bf, h_ref, atol=5e-2, rtol=5e-2)
    assert jnp.allclose(c_bf, c_ref, atol=5e-2, rtol=5e-2)

    # 3) Exercise the T-padding mask (T not a multiple of the chunk) and the
    #    batch-tile grid axis (B_pad = 16 -> 2 tiles).
    batch2, seq2 = 10, 8
    x2 = jax.random.normal(keys[7], (seq2, batch2, input_size), jnp.float32)
    h02 = jnp.zeros((1, batch2, hidden_dim), jnp.float32)
    c02 = jnp.zeros((1, batch2, hidden_dim), jnp.float32)
    out2_ref, (h2_ref, c2_ref) = _reference_forward(x2, h02, c02, w_ih, w_hh,
                                                    b_ih, b_hh, w_fc, b_fc)
    out2, (h2, c2) = simple_lstm_forward(x2, h02, c02, w_ih, w_hh, b_ih, b_hh,
                                         w_fc, b_fc,
                                         compute_dtype=jnp.float32,
                                         max_chunk=3)  # 8 = 3+3+2 -> masked pad
    jax.block_until_ready(out2)
    assert jnp.allclose(out2, out2_ref, atol=1e-5, rtol=1e-5)
    assert jnp.allclose(h2, h2_ref, atol=1e-5, rtol=1e-5)
    assert jnp.allclose(c2, c2_ref, atol=1e-5, rtol=1e-5)

    print("KERNEL_OK")
</pallas_src>

<mosaic_0001>
module attributes {stable_mosaic.version = 11 : i64} {
  func.func @_lstm_kernel(%arg0: i32, %arg1: i32, %arg2: memref<8x8x16xf32, #tpu.memory_space<vmem>>, %arg3: memref<8x32xf32, #tpu.memory_space<vmem>>, %arg4: memref<8x32xf32, #tpu.memory_space<vmem>>, %arg5: memref<16x128xf32, #tpu.memory_space<vmem>>, %arg6: memref<32x128xf32, #tpu.memory_space<vmem>>, %arg7: memref<1x128xf32, #tpu.memory_space<vmem>>, %arg8: memref<32x8xf32, #tpu.memory_space<vmem>>, %arg9: memref<1x8xf32, #tpu.memory_space<vmem>>, %arg10: memref<8x8xf32, #tpu.memory_space<vmem>>, %arg11: memref<8x32xf32, #tpu.memory_space<vmem>>, %arg12: memref<8x32xf32, #tpu.memory_space<vmem>>, %arg13: memref<8x32xf32, #tpu.memory_space<vmem>>, %arg14: memref<8x32xf32, #tpu.memory_space<vmem>>, %arg15: memref<8x8x128xf32, #tpu.memory_space<vmem>>) attributes {dimension_semantics = [#tpu.dimension_semantics<parallel>, #tpu.dimension_semantics<arbitrary>], iteration_bounds = array<i64: 1, 1>, scalar_prefetch = 0 : i64, scratch_operands = 3 : i64, tpu.core_type = #tpu.core_type<tc>, window_params = [{transform_indices = @transform_0, window_bounds = array<i64: 8, 8, 16>}, {transform_indices = @transform_1, window_bounds = array<i64: 8, 32>}, {transform_indices = @transform_2, window_bounds = array<i64: 8, 32>}, {pipeline_mode = #tpu.pipeline_mode<synchronous>, transform_indices = @transform_3, window_bounds = array<i64: 16, 128>}, {pipeline_mode = #tpu.pipeline_mode<synchronous>, transform_indices = @transform_4, window_bounds = array<i64: 32, 128>}, {pipeline_mode = #tpu.pipeline_mode<synchronous>, transform_indices = @transform_5, window_bounds = array<i64: 1, 128>}, {pipeline_mode = #tpu.pipeline_mode<synchronous>, transform_indices = @transform_6, window_bounds = array<i64: 32, 8>}, {pipeline_mode = #tpu.pipeline_mode<synchronous>, transform_indices = @transform_7, window_bounds = array<i64: 1, 8>}, {transform_indices = @transform_8, window_bounds = array<i64: 8, 8>}, {transform_indices = @transform_9, window_bounds = array<i64: 8, 32>}, {transform_indices = @transform_10, window_bounds = array<i64: 8, 32>}]} {
    %c0_i32 = arith.constant 0 : i32
    %0 = arith.cmpi eq, %arg1, %c0_i32 : i32
    %1 = arith.extui %0 : i1 to i32
    %c0_i32_0 = arith.constant 0 : i32
    %2 = arith.cmpi ne, %1, %c0_i32_0 : i32
    scf.if %2 {
      %c0_55 = arith.constant 0 : index
      %c0_56 = arith.constant 0 : index
      %188 = vector.load %arg3[%c0_55, %c0_56] : memref<8x32xf32, #tpu.memory_space<vmem>>, vector<8x32xf32>
      %c0_57 = arith.constant 0 : index
      %c0_58 = arith.constant 0 : index
      %189 = vector.load %arg13[%c0_57, %c0_58] : memref<8x32xf32, #tpu.memory_space<vmem>>, vector<8x32xf32>
      tpu.vector_store %arg13[%c0_57, %c0_58], %188 {strides = array<i32>} : memref<8x32xf32, #tpu.memory_space<vmem>>, vector<8x32xf32>,
      %c0_59 = arith.constant 0 : index
      %c0_60 = arith.constant 0 : index
      %190 = vector.load %arg4[%c0_59, %c0_60] : memref<8x32xf32, #tpu.memory_space<vmem>>, vector<8x32xf32>
      %c0_61 = arith.constant 0 : index
      %c0_62 = arith.constant 0 : index
      %191 = vector.load %arg14[%c0_61, %c0_62] : memref<8x32xf32, #tpu.memory_space<vmem>>, vector<8x32xf32>
      tpu.vector_store %arg14[%c0_61, %c0_62], %190 {strides = array<i32>} : memref<8x32xf32, #tpu.memory_space<vmem>>, vector<8x32xf32>,
    } else {
    }
    %c0 = arith.constant 0 : index
    %c0_1 = arith.constant 0 : index
    %c0_2 = arith.constant 0 : index
    %3 = vector.load %arg2[%c0, %c0_1, %c0_2] : memref<8x8x16xf32, #tpu.memory_space<vmem>>, vector<8x8x16xf32>
    %4 = vector.shape_cast %3 : vector<8x8x16xf32> to vector<64x16xf32>
    %c0_3 = arith.constant 0 : index
    %c0_4 = arith.constant 0 : index
    %5 = vector.load %arg5[%c0_3, %c0_4] : memref<16x128xf32, #tpu.memory_space<vmem>>, vector<16x128xf32>
    %cst = arith.constant dense<0.000000e+00> : vector<64x128xf32>
    %6 = tpu.matmul %4, %5, %cst {dimension_numbers = #tpu.dot_dimension_numbers<[1], [0], [0], [1], [0, 0, 1, 1], [], []>} : vector<64x16xf32>, vector<16x128xf32>, vector<64x128xf32> -> vector<64x128xf32>
    %c0_5 = arith.constant 0 : index
    %c0_6 = arith.constant 0 : index
    %7 = vector.load %arg7[%c0_5, %c0_6] : memref<1x128xf32, #tpu.memory_space<vmem>>, vector<1x128xf32>
    %8 = vector.broadcast %7 : vector<1x128xf32> to vector<64x128xf32>
    %9 = arith.addf %6, %8 : vector<64x128xf32>
    %10 = vector.shape_cast %9 : vector<64x128xf32> to vector<8x8x128xf32>
    %c0_7 = arith.constant 0 : index
    %c0_8 = arith.constant 0 : index
    %c0_9 = arith.constant 0 : index
    %11 = vector.load %arg15[%c0_7, %c0_8, %c0_9] : memref<8x8x128xf32, #tpu.memory_space<vmem>>, vector<8x8x128xf32>
    tpu.vector_store %arg15[%c0_7, %c0_8, %c0_9], %10 {strides = array<i32>} : memref<8x8x128xf32, #tpu.memory_space<vmem>>, vector<8x8x128xf32>,
    %c0_10 = arith.constant 0 : index
    %c0_11 = arith.constant 0 : index
    %12 = vector.load %arg6[%c0_10, %c0_11] : memref<32x128xf32, #tpu.memory_space<vmem>>, vector<32x128xf32>
    %c0_12 = arith.constant 0 : index
    %c0_13 = arith.constant 0 : index
    %13 = vector.load %arg13[%c0_12, %c0_13] : memref<8x32xf32, #tpu.memory_space<vmem>>, vector<8x32xf32>
    %c0_14 = arith.constant 0 : index
    %c0_15 = arith.constant 0 : index
    %14 = vector.load %arg14[%c0_14, %c0_15] : memref<8x32xf32, #tpu.memory_space<vmem>>, vector<8x32xf32>
    %c0_i32_16 = arith.constant 0 : i32
    %15 = arith.index_cast %c0_i32_16 : i32 to index
    %c0_17 = arith.constant 0 : index
    %c0_18 = arith.constant 0 : index
    %16 = vector.load %arg15[%15, %c0_17, %c0_18] : memref<8x8x128xf32, #tpu.memory_space<vmem>>, vector<1x8x128xf32>
    %17 = vector.shape_cast %16 : vector<1x8x128xf32> to vector<8x128xf32>
    %cst_19 = arith.constant dense<0.000000e+00> : vector<8x128xf32>
    %18 = tpu.matmul %13, %12, %cst_19 {dimension_numbers = #tpu.dot_dimension_numbers<[1], [0], [0], [1], [0, 0, 1, 1], [], []>} : vector<8x32xf32>, vector<32x128xf32>, vector<8x128xf32> -> vector<8x128xf32>
    %19 = arith.addf %17, %18 : vector<8x128xf32>
    %20 = vector.extract_strided_slice %19 {offsets = [0, 0], sizes = [8, 96], strides = [1, 1]} : vector<8x128xf32> to vector<8x96xf32>
    %21 = arith.negf %20 : vector<8x96xf32>
    %22 = math.exp %21 : vector<8x96xf32>
    %cst_20 = arith.constant 1.000000e+00 : f32
    %23 = vector.broadcast %cst_20 : f32 to vector<8x96xf32>
    %24 = arith.addf %23, %22 : vector<8x96xf32>
    %25 = arith.divf %23, %24 : vector<8x96xf32>
    %26 = vector.extract_strided_slice %19 {offsets = [0, 96], sizes = [8, 32], strides = [1, 1]} : vector<8x128xf32> to vector<8x32xf32>
    %27 = math.tanh %26 : vector<8x32xf32>
    %28 = vector.extract_strided_slice %25 {offsets = [0, 0], sizes = [8, 32], strides = [1, 1]} : vector<8x96xf32> to vector<8x32xf32>
    %29 = vector.extract_strided_slice %25 {offsets = [0, 32], sizes = [8, 32], strides = [1, 1]} : vector<8x96xf32> to vector<8x32xf32>
    %30 = vector.extract_strided_slice %25 {offsets = [0, 64], sizes = [8, 32], strides = [1, 1]} : vector<8x96xf32> to vector<8x32xf32>
    %31 = arith.mulf %29, %14 : vector<8x32xf32>
    %32 = arith.mulf %28, %27 : vector<8x32xf32>
    %33 = arith.addf %31, %32 : vector<8x32xf32>
    %34 = math.tanh %33 : vector<8x32xf32>
    %35 = arith.mulf %30, %34 : vector<8x32xf32>
    %c1_i32 = arith.constant 1 : i32
    %36 = arith.index_cast %c1_i32 : i32 to index
    %c0_21 = arith.constant 0 : index
    %c0_22 = arith.constant 0 : index
    %37 = vector.load %arg15[%36, %c0_21, %c0_22] : memref<8x8x128xf32, #tpu.memory_space<vmem>>, vector<1x8x128xf32>
    %38 = vector.shape_cast %37 : vector<1x8x128xf32> to vector<8x128xf32>
    %cst_23 = arith.constant dense<0.000000e+00> : vector<8x128xf32>
    %39 = tpu.matmul %35, %12, %cst_23 {dimension_numbers = #tpu.dot_dimension_numbers<[1], [0], [0], [1], [0, 0, 1, 1], [], []>} : vector<8x32xf32>, vector<32x128xf32>, vector<8x128xf32> -> vector<8x128xf32>
    %40 = arith.addf %38, %39 : vector<8x128xf32>
    %41 = vector.extract_strided_slice %40 {offsets = [0, 0], sizes = [8, 96], strides = [1, 1]} : vector<8x128xf32> to vector<8x96xf32>
    %42 = arith.negf %41 : vector<8x96xf32>
    %43 = math.exp %42 : vector<8x96xf32>
    %cst_24 = arith.constant 1.000000e+00 : f32
    %44 = vector.broadcast %cst_24 : f32 to vector<8x96xf32>
    %45 = arith.addf %44, %43 : vector<8x96xf32>
    %46 = arith.divf %44, %45 : vector<8x96xf32>
    %47 = vector.extract_strided_slice %40 {offsets = [0, 96], sizes = [8, 32], strides = [1, 1]} : vector<8x128xf32> to vector<8x32xf32>
    %48 = math.tanh %47 : vector<8x32xf32>
    %49 = vector.extract_strided_slice %46 {offsets = [0, 0], sizes = [8, 32], strides = [1, 1]} : vector<8x96xf32> to vector<8x32xf32>
    %50 = vector.extract_strided_slice %46 {offsets = [0, 32], sizes = [8, 32], strides = [1, 1]} : vector<8x96xf32> to vector<8x32xf32>
    %51 = vector.extract_strided_slice %46 {offsets = [0, 64], sizes = [8, 32], strides = [1, 1]} : vector<8x96xf32> to vector<8x32xf32>
    %52 = arith.mulf %50, %33 : vector<8x32xf32>
    %53 = arith.mulf %49, %48 : vector<8x32xf32>
    %54 = arith.addf %52, %53 : vector<8x32xf32>
    %55 = math.tanh %54 : vector<8x32xf32>
    %56 = arith.mulf %51, %55 : vector<8x32xf32>
    %c2_i32 = arith.constant 2 : i32
    %57 = arith.index_cast %c2_i32 : i32 to index
    %c0_25 = arith.constant 0 : index
    %c0_26 = arith.constant 0 : index
    %58 = vector.load %arg15[%57, %c0_25, %c0_26] : memref<8x8x128xf32, #tpu.memory_space<vmem>>, vector<1x8x128xf32>
    %59 = vector.shape_cast %58 : vector<1x8x128xf32> to vector<8x128xf32>
    %cst_27 = arith.constant dense<0.000000e+00> : vector<8x128xf32>
    %60 = tpu.matmul %56, %12, %cst_27 {dimension_numbers = #tpu.dot_dimension_numbers<[1], [0], [0], [1], [0, 0, 1, 1], [], []>} : vector<8x32xf32>, vector<32x128xf32>, vector<8x128xf32> -> vector<8x128xf32>
    %61 = arith.addf %59, %60 : vector<8x128xf32>
    %62 = vector.extract_strided_slice %61 {offsets = [0, 0], sizes = [8, 96], strides = [1, 1]} : vector<8x128xf32> to vector<8x96xf32>
    %63 = arith.negf %62 : vector<8x96xf32>
    %64 = math.exp %63 : vector<8x96xf32>
    %cst_28 = arith.constant 1.000000e+00 : f32
    %65 = vector.broadcast %cst_28 : f32 to vector<8x96xf32>
    %66 = arith.addf %65, %64 : vector<8x96xf32>
    %67 = arith.divf %65, %66 : vector<8x96xf32>
    %68 = vector.extract_strided_slice %61 {offsets = [0, 96], sizes = [8, 32], strides = [1, 1]} : vector<8x128xf32> to vector<8x32xf32>
    %69 = math.tanh %68 : vector<8x32xf32>
    %70 = vector.extract_strided_slice %67 {offsets = [0, 0], sizes = [8, 32], strides = [1, 1]} : vector<8x96xf32> to vector<8x32xf32>
    %71 = vector.extract_strided_slice %67 {offsets = [0, 32], sizes = [8, 32], strides = [1, 1]} : vector<8x96xf32> to vector<8x32xf32>
    %72 = vector.extract_strided_slice %67 {offsets = [0, 64], sizes = [8, 32], strides = [1, 1]} : vector<8x96xf32> to vector<8x32xf32>
    %73 = arith.mulf %71, %54 : vector<8x32xf32>
    %74 = arith.mulf %70, %69 : vector<8x32xf32>
    %75 = arith.addf %73, %74 : vector<8x32xf32>
    %76 = math.tanh %75 : vector<8x32xf32>
    %77 = arith.mulf %72, %76 : vector<8x32xf32>
    %c3_i32 = arith.constant 3 : i32
    %78 = arith.index_cast %c3_i32 : i32 to index
    %c0_29 = arith.constant 0 : index
    %c0_30 = arith.constant 0 : index
    %79 = vector.load %arg15[%78, %c0_29, %c0_30] : memref<8x8x128xf32, #tpu.memory_space<vmem>>, vector<1x8x128xf32>
    %80 = vector.shape_cast %79 : vector<1x8x128xf32> to vector<8x128xf32>
    %cst_31 = arith.constant dense<0.000000e+00> : vector<8x128xf32>
    %81 = tpu.matmul %77, %12, %cst_31 {dimension_numbers = #tpu.dot_dimension_numbers<[1], [0], [0], [1], [0, 0, 1, 1], [], []>} : vector<8x32xf32>, vector<32x128xf32>, vector<8x128xf32> -> vector<8x128xf32>
    %82 = arith.addf %80, %81 : vector<8x128xf32>
    %83 = vector.extract_strided_slice %82 {offsets = [0, 0], sizes = [8, 96], strides = [1, 1]} : vector<8x128xf32> to vector<8x96xf32>
    %84 = arith.negf %83 : vector<8x96xf32>
    %85 = math.exp %84 : vector<8x96xf32>
    %cst_32 = arith.constant 1.000000e+00 : f32
    %86 = vector.broadcast %cst_32 : f32 to vector<8x96xf32>
    %87 = arith.addf %86, %85 : vector<8x96xf32>
    %88 = arith.divf %86, %87 : vector<8x96xf32>
    %89 = vector.extract_strided_slice %82 {offsets = [0, 96], sizes = [8, 32], strides = [1, 1]} : vector<8x128xf32> to vector<8x32xf32>
    %90 = math.tanh %89 : vector<8x32xf32>
    %91 = vector.extract_strided_slice %88 {offsets = [0, 0], sizes = [8, 32], strides = [1, 1]} : vector<8x96xf32> to vector<8x32xf32>
    %92 = vector.extract_strided_slice %88 {offsets = [0, 32], sizes = [8, 32], strides = [1, 1]} : vector<8x96xf32> to vector<8x32xf32>
    %93 = vector.extract_strided_slice %88 {offsets = [0, 64], sizes = [8, 32], strides = [1, 1]} : vector<8x96xf32> to vector<8x32xf32>
    %94 = arith.mulf %92, %75 : vector<8x32xf32>
    %95 = arith.mulf %91, %90 : vector<8x32xf32>
    %96 = arith.addf %94, %95 : vector<8x32xf32>
    %97 = math.tanh %96 : vector<8x32xf32>
    %98 = arith.mulf %93, %97 : vector<8x32xf32>
    %c4_i32 = arith.constant 4 : i32
    %99 = arith.index_cast %c4_i32 : i32 to index
    %c0_33 = arith.constant 0 : index
    %c0_34 = arith.constant 0 : index
    %100 = vector.load %arg15[%99, %c0_33, %c0_34] : memref<8x8x128xf32, #tpu.memory_space<vmem>>, vector<1x8x128xf32>
    %101 = vector.shape_cast %100 : vector<1x8x128xf32> to vector<8x128xf32>
    %cst_35 = arith.constant dense<0.000000e+00> : vector<8x128xf32>
    %102 = tpu.matmul %98, %12, %cst_35 {dimension_numbers = #tpu.dot_dimension_numbers<[1], [0], [0], [1], [0, 0, 1, 1], [], []>} : vector<8x32xf32>, vector<32x128xf32>, vector<8x128xf32> -> vector<8x128xf32>
    %103 = arith.addf %101, %102 : vector<8x128xf32>
    %104 = vector.extract_strided_slice %103 {offsets = [0, 0], sizes = [8, 96], strides = [1, 1]} : vector<8x128xf32> to vector<8x96xf32>
    %105 = arith.negf %104 : vector<8x96xf32>
    %106 = math.exp %105 : vector<8x96xf32>
    %cst_36 = arith.constant 1.000000e+00 : f32
    %107 = vector.broadcast %cst_36 : f32 to vector<8x96xf32>
    %108 = arith.addf %107, %106 : vector<8x96xf32>
    %109 = arith.divf %107, %108 : vector<8x96xf32>
    %110 = vector.extract_strided_slice %103 {offsets = [0, 96], sizes = [8, 32], strides = [1, 1]} : vector<8x128xf32> to vector<8x32xf32>
    %111 = math.tanh %110 : vector<8x32xf32>
    %112 = vector.extract_strided_slice %109 {offsets = [0, 0], sizes = [8, 32], strides = [1, 1]} : vector<8x96xf32> to vector<8x32xf32>
    %113 = vector.extract_strided_slice %109 {offsets = [0, 32], sizes = [8, 32], strides = [1, 1]} : vector<8x96xf32> to vector<8x32xf32>
    %114 = vector.extract_strided_slice %109 {offsets = [0, 64], sizes = [8, 32], strides = [1, 1]} : vector<8x96xf32> to vector<8x32xf32>
    %115 = arith.mulf %113, %96 : vector<8x32xf32>
    %116 = arith.mulf %112, %111 : vector<8x32xf32>
    %117 = arith.addf %115, %116 : vector<8x32xf32>
    %118 = math.tanh %117 : vector<8x32xf32>
    %119 = arith.mulf %114, %118 : vector<8x32xf32>
    %c5_i32 = arith.constant 5 : i32
    %120 = arith.index_cast %c5_i32 : i32 to index
    %c0_37 = arith.constant 0 : index
    %c0_38 = arith.constant 0 : index
    %121 = vector.load %arg15[%120, %c0_37, %c0_38] : memref<8x8x128xf32, #tpu.memory_space<vmem>>, vector<1x8x128xf32>
    %122 = vector.shape_cast %121 : vector<1x8x128xf32> to vector<8x128xf32>
    %cst_39 = arith.constant dense<0.000000e+00> : vector<8x128xf32>
    %123 = tpu.matmul %119, %12, %cst_39 {dimension_numbers = #tpu.dot_dimension_numbers<[1], [0], [0], [1], [0, 0, 1, 1], [], []>} : vector<8x32xf32>, vector<32x128xf32>, vector<8x128xf32> -> vector<8x128xf32>
    %124 = arith.addf %122, %123 : vector<8x128xf32>
    %125 = vector.extract_strided_slice %124 {offsets = [0, 0], sizes = [8, 96], strides = [1, 1]} : vector<8x128xf32> to vector<8x96xf32>
    %126 = arith.negf %125 : vector<8x96xf32>
    %127 = math.exp %126 : vector<8x96xf32>
    %cst_40 = arith.constant 1.000000e+00 : f32
    %128 = vector.broadcast %cst_40 : f32 to vector<8x96xf32>
    %129 = arith.addf %128, %127 : vector<8x96xf32>
    %130 = arith.divf %128, %129 : vector<8x96xf32>
    %131 = vector.extract_strided_slice %124 {offsets = [0, 96], sizes = [8, 32], strides = [1, 1]} : vector<8x128xf32> to vector<8x32xf32>
    %132 = math.tanh %131 : vector<8x32xf32>
    %133 = vector.extract_strided_slice %130 {offsets = [0, 0], sizes = [8, 32], strides = [1, 1]} : vector<8x96xf32> to vector<8x32xf32>
    %134 = vector.extract_strided_slice %130 {offsets = [0, 32], sizes = [8, 32], strides = [1, 1]} : vector<8x96xf32> to vector<8x32xf32>
    %135 = vector.extract_strided_slice %130 {offsets = [0, 64], sizes = [8, 32], strides = [1, 1]} : vector<8x96xf32> to vector<8x32xf32>
    %136 = arith.mulf %134, %117 : vector<8x32xf32>
    %137 = arith.mulf %133, %132 : vector<8x32xf32>
    %138 = arith.addf %136, %137 : vector<8x32xf32>
    %139 = math.tanh %138 : vector<8x32xf32>
    %140 = arith.mulf %135, %139 : vector<8x32xf32>
    %c6_i32 = arith.constant 6 : i32
    %141 = arith.index_cast %c6_i32 : i32 to index
    %c0_41 = arith.constant 0 : index
    %c0_42 = arith.constant 0 : index
    %142 = vector.load %arg15[%141, %c0_41, %c0_42] : memref<8x8x128xf32, #tpu.memory_space<vmem>>, vector<1x8x128xf32>
    %143 = vector.shape_cast %142 : vector<1x8x128xf32> to vector<8x128xf32>
    %cst_43 = arith.constant dense<0.000000e+00> : vector<8x128xf32>
    %144 = tpu.matmul %140, %12, %cst_43 {dimension_numbers = #tpu.dot_dimension_numbers<[1], [0], [0], [1], [0, 0, 1, 1], [], []>} : vector<8x32xf32>, vector<32x128xf32>, vector<8x128xf32> -> vector<8x128xf32>
    %145 = arith.addf %143, %144 : vector<8x128xf32>
    %146 = vector.extract_strided_slice %145 {offsets = [0, 0], sizes = [8, 96], strides = [1, 1]} : vector<8x128xf32> to vector<8x96xf32>
    %147 = arith.negf %146 : vector<8x96xf32>
    %148 = math.exp %147 : vector<8x96xf32>
    %cst_44 = arith.constant 1.000000e+00 : f32
    %149 = vector.broadcast %cst_44 : f32 to vector<8x96xf32>
    %150 = arith.addf %149, %148 : vector<8x96xf32>
    %151 = arith.divf %149, %150 : vector<8x96xf32>
    %152 = vector.extract_strided_slice %145 {offsets = [0, 96], sizes = [8, 32], strides = [1, 1]} : vector<8x128xf32> to vector<8x32xf32>
    %153 = math.tanh %152 : vector<8x32xf32>
    %154 = vector.extract_strided_slice %151 {offsets = [0, 0], sizes = [8, 32], strides = [1, 1]} : vector<8x96xf32> to vector<8x32xf32>
    %155 = vector.extract_strided_slice %151 {offsets = [0, 32], sizes = [8, 32], strides = [1, 1]} : vector<8x96xf32> to vector<8x32xf32>
    %156 = vector.extract_strided_slice %151 {offsets = [0, 64], sizes = [8, 32], strides = [1, 1]} : vector<8x96xf32> to vector<8x32xf32>
    %157 = arith.mulf %155, %138 : vector<8x32xf32>
    %158 = arith.mulf %154, %153 : vector<8x32xf32>
    %159 = arith.addf %157, %158 : vector<8x32xf32>
    %160 = math.tanh %159 : vector<8x32xf32>
    %161 = arith.mulf %156, %160 : vector<8x32xf32>
    %c7_i32 = arith.constant 7 : i32
    %162 = arith.index_cast %c7_i32 : i32 to index
    %c0_45 = arith.constant 0 : index
    %c0_46 = arith.constant 0 : index
    %163 = vector.load %arg15[%162, %c0_45, %c0_46] : memref<8x8x128xf32, #tpu.memory_space<vmem>>, vector<1x8x128xf32>
    %164 = vector.shape_cast %163 : vector<1x8x128xf32> to vector<8x128xf32>
    %cst_47 = arith.constant dense<0.000000e+00> : vector<8x128xf32>
    %165 = tpu.matmul %161, %12, %cst_47 {dimension_numbers = #tpu.dot_dimension_numbers<[1], [0], [0], [1], [0, 0, 1, 1], [], []>} : vector<8x32xf32>, vector<32x128xf32>, vector<8x128xf32> -> vector<8x128xf32>
    %166 = arith.addf %164, %165 : vector<8x128xf32>
    %167 = vector.extract_strided_slice %166 {offsets = [0, 0], sizes = [8, 96], strides = [1, 1]} : vector<8x128xf32> to vector<8x96xf32>
    %168 = arith.negf %167 : vector<8x96xf32>
    %169 = math.exp %168 : vector<8x96xf32>
    %cst_48 = arith.constant 1.000000e+00 : f32
    %170 = vector.broadcast %cst_48 : f32 to vector<8x96xf32>
    %171 = arith.addf %170, %169 : vector<8x96xf32>
    %172 = arith.divf %170, %171 : vector<8x96xf32>
    %173 = vector.extract_strided_slice %166 {offsets = [0, 96], sizes = [8, 32], strides = [1, 1]} : vector<8x128xf32> to vector<8x32xf32>
    %174 = math.tanh %173 : vector<8x32xf32>
    %175 = vector.extract_strided_slice %172 {offsets = [0, 0], sizes = [8, 32], strides = [1, 1]} : vector<8x96xf32> to vector<8x32xf32>
    %176 = vector.extract_strided_slice %172 {offsets = [0, 32], sizes = [8, 32], strides = [1, 1]} : vector<8x96xf32> to vector<8x32xf32>
    %177 = vector.extract_strided_slice %172 {offsets = [0, 64], sizes = [8, 32], strides = [1, 1]} : vector<8x96xf32> to vector<8x32xf32>
    %178 = arith.mulf %176, %159 : vector<8x32xf32>
    %179 = arith.mulf %175, %174 : vector<8x32xf32>
    %180 = arith.addf %178, %179 : vector<8x32xf32>
    %181 = math.tanh %180 : vector<8x32xf32>
    %182 = arith.mulf %177, %181 : vector<8x32xf32>
    %c8_i32 = arith.constant 8 : i32
    %c0_49 = arith.constant 0 : index
    %c0_50 = arith.constant 0 : index
    %183 = vector.load %arg13[%c0_49, %c0_50] : memref<8x32xf32, #tpu.memory_space<vmem>>, vector<8x32xf32>
    tpu.vector_store %arg13[%c0_49, %c0_50], %182 {strides = array<i32>} : memref<8x32xf32, #tpu.memory_space<vmem>>, vector<8x32xf32>,
    %c0_51 = arith.constant 0 : index
    %c0_52 = arith.constant 0 : index
    %184 = vector.load %arg14[%c0_51, %c0_52] : memref<8x32xf32, #tpu.memory_space<vmem>>, vector<8x32xf32>
    tpu.vector_store %arg14[%c0_51, %c0_52], %180 {strides = array<i32>} : memref<8x32xf32, #tpu.memory_space<vmem>>, vector<8x32xf32>,
    %c0_i32_53 = arith.constant 0 : i32
    %185 = arith.cmpi eq, %arg1, %c0_i32_53 : i32
    %186 = arith.extui %185 : i1 to i32
    %c0_i32_54 = arith.constant 0 : i32
    %187 = arith.cmpi ne, %186, %c0_i32_54 : i32
    scf.if %187 {
      %c0_55 = arith.constant 0 : index
      %c0_56 = arith.constant 0 : index
      %188 = vector.load %arg11[%c0_55, %c0_56] : memref<8x32xf32, #tpu.memory_space<vmem>>, vector<8x32xf32>
      tpu.vector_store %arg11[%c0_55, %c0_56], %182 {strides = array<i32>} : memref<8x32xf32, #tpu.memory_space<vmem>>, vector<8x32xf32>,
      %c0_57 = arith.constant 0 : index
      %c0_58 = arith.constant 0 : index
      %189 = vector.load %arg12[%c0_57, %c0_58] : memref<8x32xf32, #tpu.memory_space<vmem>>, vector<8x32xf32>
      tpu.vector_store %arg12[%c0_57, %c0_58], %180 {strides = array<i32>} : memref<8x32xf32, #tpu.memory_space<vmem>>, vector<8x32xf32>,
      %c0_59 = arith.constant 0 : index
      %c0_60 = arith.constant 0 : index
      %190 = vector.load %arg8[%c0_59, %c0_60] : memref<32x8xf32, #tpu.memory_space<vmem>>, vector<32x8xf32>
      %cst_61 = arith.constant dense<0.000000e+00> : vector<8x8xf32>
      %191 = tpu.matmul %182, %190, %cst_61 {dimension_numbers = #tpu.dot_dimension_numbers<[1], [0], [0], [1], [0, 0, 1, 1], [], []>} : vector<8x32xf32>, vector<32x8xf32>, vector<8x8xf32> -> vector<8x8xf32>
      %c0_62 = arith.constant 0 : index
      %c0_63 = arith.constant 0 : index
      %192 = vector.load %arg9[%c0_62, %c0_63] : memref<1x8xf32, #tpu.memory_space<vmem>>, vector<1x8xf32>
      %193 = vector.broadcast %192 : vector<1x8xf32> to vector<8x8xf32>
      %194 = arith.addf %191, %193 : vector<8x8xf32>
      %c0_64 = arith.constant 0 : index
      %c0_65 = arith.constant 0 : index
      %195 = vector.load %arg10[%c0_64, %c0_65] : memref<8x8xf32, #tpu.memory_space<vmem>>, vector<8x8xf32>
      tpu.vector_store %arg10[%c0_64, %c0_65], %194 {strides = array<i32>} : memref<8x8xf32, #tpu.memory_space<vmem>>, vector<8x8xf32>,
    } else {
    }
    return
  }
  func.func @transform_0(%arg0: i32, %arg1: i32) -> (i32, i32, i32) {
    %c0_i32 = arith.constant 0 : i32
    %c0_i32_0 = arith.constant 0 : i32
    return %arg1, %arg0, %c0_i32 : i32, i32, i32
  }
  func.func @transform_1(%arg0: i32, %arg1: i32) -> (i32, i32) {
    %c0_i32 = arith.constant 0 : i32
    %c0_i32_0 = arith.constant 0 : i32
    return %arg0, %c0_i32 : i32, i32
  }
  func.func @transform_2(%arg0: i32, %arg1: i32) -> (i32, i32) {
    %c0_i32 = arith.constant 0 : i32
    %c0_i32_0 = arith.constant 0 : i32
    return %arg0, %c0_i32 : i32, i32
  }
  func.func @transform_3(%arg0: i32, %arg1: i32) -> (i32, i32) {
    %c0_i32 = arith.constant 0 : i32
    %c0_i32_0 = arith.constant 0 : i32
    %c0_i32_1 = arith.constant 0 : i32
    return %c0_i32, %c0_i32_0 : i32, i32
  }
  func.func @transform_4(%arg0: i32, %arg1: i32) -> (i32, i32) {
    %c0_i32 = arith.constant 0 : i32
    %c0_i32_0 = arith.constant 0 : i32
    %c0_i32_1 = arith.constant 0 : i32
    return %c0_i32, %c0_i32_0 : i32, i32
  }
  func.func @transform_5(%arg0: i32, %arg1: i32) -> (i32, i32) {
    %c0_i32 = arith.constant 0 : i32
    %c0_i32_0 = arith.constant 0 : i32
    %c0_i32_1 = arith.constant 0 : i32
    return %c0_i32, %c0_i32_0 : i32, i32
  }
  func.func @transform_6(%arg0: i32, %arg1: i32) -> (i32, i32) {
    %c0_i32 = arith.constant 0 : i32
    %c0_i32_0 = arith.constant 0 : i32
    %c0_i32_1 = arith.constant 0 : i32
    return %c0_i32, %c0_i32_0 : i32, i32
  }
  func.func @transform_7(%arg0: i32, %arg1: i32) -> (i32, i32) {
    %c0_i32 = arith.constant 0 : i32
    %c0_i32_0 = arith.constant 0 : i32
    %c0_i32_1 = arith.constant 0 : i32
    return %c0_i32, %c0_i32_0 : i32, i32
  }
  func.func @transform_8(%arg0: i32, %arg1: i32) -> (i32, i32) {
    %c0_i32 = arith.constant 0 : i32
    %c0_i32_0 = arith.constant 0 : i32
    return %arg0, %c0_i32 : i32, i32
  }
  func.func @transform_9(%arg0: i32, %arg1: i32) -> (i32, i32) {
    %c0_i32 = arith.constant 0 : i32
    %c0_i32_0 = arith.constant 0 : i32
    return %arg0, %c0_i32 : i32, i32
  }
  func.func @transform_10(%arg0: i32, %arg1: i32) -> (i32, i32) {
    %c0_i32 = arith.constant 0 : i32
    %c0_i32_0 = arith.constant 0 : i32
    return %arg0, %c0_i32 : i32, i32
  }
}

</mosaic_0001>

<bundles_post_ra>
// kernel: simple_lstm_forward.1
= control target key start
LH: loop header
LB: loop body
LE: loop exit
PB: predicated region body
PF: predicated region fallthrough
CT: control target
= control target key end

     0   :  { %v1398_v1 = vmov 0.0   ;;  %vm58_vm0 = vcmask 130048   ;;  %vm1399_vm1 = vmmov 0   ;;  %vm37_vm2 = vcmask 261120   ;;  %s1400_s12 = smov 32   ;;  %s1705_s3 = inlined_call_operand.vmem [shape: f32[16,128], index: 3, kind: input, shape index: {}]   ;;  %s1706_s4 = inlined_call_operand.vmem [shape: f32[32,128], index: 4, kind: input, shape index: {}]   ;;  %s1707_s0 = inlined_call_operand.vmem [shape: f32[8,8,16], index: 0, kind: input, shape index: {}]   ;;  %s1708_s1 = inlined_call_operand.vmem [shape: f32[8,32], index: 1, kind: input, shape index: {}]   ;;  %s1709_s2 = inlined_call_operand.vmem [shape: f32[8,32], index: 2, kind: input, shape index: {}]   ;;  %s1710_s5 = inlined_call_operand.vmem [shape: f32[1,128], index: 5, kind: input, shape index: {}]   ;;  %s1711_s6 = inlined_call_operand.vmem [shape: f32[32,8], index: 6, kind: input, shape index: {}]   ;;  %s1712_s10 = inlined_call_operand.vmem [shape: f32[8,32], index: 10, kind: output, shape index: {2}]   ;;  %s1713_s9 = inlined_call_operand.vmem [shape: f32[8,32], index: 9, kind: output, shape index: {1}]   ;;  %s1714_s7 = inlined_call_operand.vmem [shape: f32[1,8], index: 7, kind: input, shape index: {}]   ;;  %s1715_s8 = inlined_call_operand.vmem [shape: f32[8,8], index: 8, kind: output, shape index: {0}]  }
   0x1   :  { %v50_v0 = vld [vmem:[%s1705_s3 + $0x8] sm:$0xff]  ;;  %1230 = vmatprep.subr.mxu1 %v1398_v1  ;;  %v1465_v2 = vld [vmem:[%s1706_s4 + $0x18] sm:$0xff]  ;;  %v49_v3 = vld [vmem:[%s1705_s3] sm:$0xff]  ;;  %1238 = vmatprep.mubr.msk.f32.mxu1 %vm1399_vm1, %v1398_v1  ;;  %vm1118_vm3 = vcmask 64512  }
   0x2   :  { %1214 = vmatprep.subr.mxu0 %v50_v0  ;;  %1231 = vmatpush3.msra.mxu1 %v1465_v2  ;;  %v41_v4 = vld [vmem:[%s1707_s0] sm:$0xff]  ;;  %v1479_v5 = vld [vmem:[%s1706_s4 + $0x10] sm:$0xff]  ;;  %v42_v6 = vld [vmem:[%s1707_s0 + $0x8] sm:$0xff] }
   0x3   :  { %1215 = vmatpush3.msra.mxu0 %v50_v0  ;;  %1232 = vmatprep.subr.mxu1 %v1398_v1  ;;  %v36_v7 = vld [vmem:[%s1708_s1] sm:$0xff]  ;;  %v1492_v8 = vld [vmem:[%s1706_s4 + $0x8] sm:$0xff]  ;;  %v43_v49 = vld [vmem:[%s1707_s0 + $0x10] sm:$0xff]  ;;  %s1402_s1 = smov 96  }
   0x4   :  { %1216 = vmatprep.subr.mxu0 %v49_v3  ;;  %1218 = vmatprep.mubr.msk.f32.mxu0 %vm58_vm0, %v41_v4  ;;  %38 = vst.msk [vmem:[#allocation2] sm:$0xff] %vm37_vm2, %v36_v7  ;;  %v1501_v9 = vld [vmem:[%s1706_s4] sm:$0xff]  ;;  %v44_v50 = vld [vmem:[%s1707_s0 + $0x18] sm:$0xff]  ;;  %v46_v52 = vld [vmem:[%s1707_s0 + $0x28] sm:$0xff] }
   0x5   :  { %1217 = vmatpush3.msra.mxu0 %v49_v3  ;;  %1233 = vmatpush3.msra.mxu1 %v1479_v5  ;;  %v39_v11 = vld [vmem:[%s1709_s2] sm:$0xff]  ;;  %s1401_s2 = smov 64   ;;  %v47_v53 = vld [vmem:[%s1707_s0 + $0x30] sm:$0xff]  ;;  %v48_v54 = vld [vmem:[%s1707_s0 + $0x38] sm:$0xff] }
   0x6   :  { %1219 = vmatmul.mubr.msk.f32.vlgmr.msra.gmra.mxu0 %vm58_vm0, %v42_v6  ;;  %1234 = vmatprep.subr.mxu1 %v1398_v1  ;;  %40 = vst.msk [vmem:[#allocation3] sm:$0xff] %vm37_vm2, %v39_v11  ;;  %v1534_v13 = vld [vmem:[%s1710_s5] ss:$0 sm:$0xff] }
   0x7   :  { %1235 = vmatpush3.msra.mxu1 %v1492_v8  ;;  %1252 = vmatprep.subr.mxu0 %v1398_v1  ;;  %v45_v51 = vld [vmem:[%s1707_s0 + $0x20] sm:$0xff] }
   0x8   :  { %1236 = vmatprep.subr.mxu1 %v1398_v1  ;;  %1253 = vmatpush3.msra.mxu0 %v1465_v2 }
   0x9   :  { %1237 = vmatpush3.msra.mxu1 %v1501_v9  ;;  %1254 = vmatprep.subr.mxu0 %v1398_v1 }
   0xa   :  { %1241 = vmatprep.subr.mxu1 %v1398_v1  ;;  %1255 = vmatpush3.msra.mxu0 %v1479_v5 }
   0xb   :  { %v200_v10 = vld [vmem:[#allocation2] sm:$0xff]  ;;  %1256 = vmatprep.subr.mxu0 %v1398_v1  ;;  %1221 = vmatprep.mubr.msk.f32.mxu0 %vm58_vm0, %v43_v49 }
   0xc   :  { %1239 = vmatmul.mubr.msk.f32.vlgmr.msra.gmra.mxu1 %vm37_vm2, %v200_v10  ;;  %1257 = vmatpush3.msra.mxu0 %v1492_v8 }
   0xd   :  { %1242 = vmatpush3.msra.mxu1 %v1465_v2  ;;  %1249 = vmatprep.mubr.msk.f32.mxu1 %vm1399_vm1, %v1398_v1  ;;  %v201_v20 = vld [vmem:[#allocation3] sm:$0xff] }
   0xe   :  { %1243 = vmatprep.subr.mxu1 %v1398_v1  ;;  %1258 = vmatprep.subr.mxu0 %v1398_v1 }
   0xf   :  { %1244 = vmatpush3.msra.mxu1 %v1479_v5  ;;  %1259 = vmatpush3.msra.mxu0 %v1501_v9 }
  0x10   :  { %1245 = vmatprep.subr.mxu1 %v1398_v1  ;;  %1274 = vmatprep.subr.mxu0 %v1398_v1 }
  0x11   :  { %1246 = vmatpush3.msra.mxu1 %v1492_v8  ;;  %1222 = vmatmul.mubr.msk.f32.gmra.mxu0 %vm58_vm0, %v44_v50 }
  0x12   :  { %1247 = vmatprep.subr.mxu1 %v1398_v1  ;;  %1224 = vmatprep.mubr.msk.f32.mxu0 %vm58_vm0, %v45_v51 }
  0x13   :  { %1248 = vmatpush3.msra.mxu1 %v1501_v9 }
  0x14   :  { %1263 = vmatprep.subr.mxu1 %v1398_v1 }
  0x15   :  { %1225 = vmatmul.mubr.msk.f32.gmra.mxu0 %vm58_vm0, %v46_v52 }
  0x16   :  { %1227 = vmatprep.mubr.msk.f32.mxu0 %vm58_vm0, %v47_v53 }
  0x19   :  { %1228 = vmatmul.mubr.msk.f32.gmra.mxu0 %vm58_vm0, %v48_v54 }
  0x1a   :  { %1260 = vmatprep.mubr.msk.f32.mxu0 %vm1399_vm1, %v1398_v1 }
  0xc6   :  { %v1220_v12 = vpop.f32.mrf.mxu0 }
  0xc7   :  { %v155_v35 = vadd.f32 %v1220_v12, %v1534_v13 }
  0xc8   :  { %v149_v14 = vpop.f32.mrf.mxu0 }
  0xc9   :  { %v150_v15 = vadd.f32 %v1534_v13, %v149_v14 }
  0xcc   :  { %v273_v16 = vpop.f32.mrf.mxu1 }
  0xcd   :  { %v277_v17 = vadd.f32 %v273_v16, %v150_v15 }
  0xce   :  { %v1240_v18 = vpop.f32.mrf.mxu1 }
  0xcf   :  { %1334 = vtanh.f32 %v277_v17  ;;  %v1142_v21 = vmul.f32 -1.442695, %v277_v17 }
  0xd1   :  { %1336 = vpow2.f32 %v1142_v21  ;;  %v1223_v59 = vpop.f32.mrf.mxu0 }
  0xd3   :  { %v159_v60 = vpop.f32.mrf.mxu0 }
  0xd4   :  { %v160_v3 = vadd.f32 %v1534_v13, %v159_v60 }
  0xd5   :  { %v1595_v61 = vpop.f32.mrf.mxu0 }
  0xd7   :  { %v1597_v62 = vpop.f32.mrf.mxu0 }
  0xd9   :  { %v1599_v63 = vpop.f32.mrf.mxu0 }
  0xdb   :  { %v1601_v0 = vpop.f32.mrf.mxu0 }
  0xdc   :  { %v1335_v19 = vpop.eup %1334 }
  0xdd   :  { %291 = vrot.lane.b32.xlu0 %v1335_v19, %s1400_s12 }
  0xde   :  { %v1337_v22 = vpop.eup %1336 }
  0xdf   :  { %v281_v23 = vadd.f32 1.0, %v1337_v22 }
  0xe1   :  { %286 = vrot.lane.b32.xlu0 %v201_v20, %s1400_s12  ;;  %1338 = vrcp.f32 %v281_v23 }
  0xee   :  { %v1339_v24 = vpop.eup %1338 }
 0x14f   :  { %v292_v25 = vpop.permute.xlu0 %291 }
 0x150   :  { %v294_v26 = vmul.f32 %v1339_v24, %v292_v25  ;;  %v165_v25 = vadd.f32 %v1223_v59, %v1534_v13 }
 0x152   :  { %296 = vrot.lane.b32.xlu1 %v294_v26, %s1400_s12 }
 0x153   :  { %v287_v27 = vpop.permute.xlu0 %286 }
 0x154   :  { %v289_v28 = vmul.f32 %v1339_v24, %v287_v27 }
 0x1c4   :  { %v297_v29 = vpop.permute.xlu1 %296 }
 0x1c5   :  { %v299_v30 = vadd.f32 %v297_v29, %v289_v28 }
 0x1c7   :  { %1340 = vtanh.f32 %v299_v30 }
 0x1d4   :  { %v1341_v31 = vpop.eup %1340 }
 0x1d5   :  { %302 = vrot.lane.b32.xlu1 %v1341_v31, %s1400_s12 }
 0x247   :  { %v303_v32 = vpop.permute.xlu1 %302 }
 0x248   :  { %v305_v33 = vmul.f32 %v1339_v24, %v303_v32 }
 0x24a   :  { %309 = vrot.lane.b32.xlu0 %v305_v33, %s1401_s2 }
 0x2bc   :  { %v310_v34 = vpop.permute.xlu0 %309 }
 0x2bd   :  { %1250 = vmatmul.mubr.msk.f32.vlgmr.msra.gmra.mxu1 %vm37_vm2, %v310_v34 }
 0x2be   :  { %1264 = vmatpush3.msra.mxu1 %v1465_v2  ;;  %1271 = vmatprep.mubr.msk.f32.mxu1 %vm1399_vm1, %v1398_v1 }
 0x2bf   :  { %1265 = vmatprep.subr.mxu1 %v1398_v1 }
 0x2c0   :  { %1266 = vmatpush3.msra.mxu1 %v1479_v5 }
 0x2c1   :  { %1267 = vmatprep.subr.mxu1 %v1398_v1 }
 0x2c2   :  { %1268 = vmatpush3.msra.mxu1 %v1492_v8 }
 0x2c3   :  { %1269 = vmatprep.subr.mxu1 %v1398_v1 }
 0x2c4   :  { %1270 = vmatpush3.msra.mxu1 %v1501_v9 }
 0x2c5   :  { %1285 = vmatprep.subr.mxu1 %v1398_v1 }
 0x37d   :  { %v379_v36 = vpop.f32.mrf.mxu1 }
 0x37e   :  { %v383_v37 = vadd.f32 %v379_v36, %v155_v35 }
 0x37f   :  { %v1251_v38 = vpop.f32.mrf.mxu1 }
 0x380   :  { %1342 = vtanh.f32 %v383_v37  ;;  %v1144_v40 = vmul.f32 -1.442695, %v383_v37 }
 0x382   :  { %1344 = vpow2.f32 %v1144_v40 }
 0x38d   :  { %v1343_v39 = vpop.eup %1342 }
 0x38e   :  { %393 = vrot.lane.b32.xlu1 %v1343_v39, %s1400_s12 }
 0x38f   :  { %v1345_v41 = vpop.eup %1344 }
 0x390   :  { %v387_v42 = vadd.f32 1.0, %v1345_v41 }
 0x392   :  { %1346 = vrcp.f32 %v387_v42 }
 0x39f   :  { %v1347_v43 = vpop.eup %1346 }
 0x3a0   :  { %v391_v46 = vmul.f32 %v1347_v43, %v299_v30 }
 0x400   :  { %v394_v44 = vpop.permute.xlu1 %393 }
 0x401   :  { %v396_v45 = vmul.f32 %v1347_v43, %v394_v44 }
 0x403   :  { %398 = vrot.lane.b32.xlu0 %v396_v45, %s1400_s12 }
 0x475   :  { %v399_v47 = vpop.permute.xlu0 %398 }
 0x476   :  { %v401_v48 = vadd.f32 %v399_v47, %v391_v46 }
 0x478   :  { %1348 = vtanh.f32 %v401_v48 }
 0x485   :  { %v1349_v55 = vpop.eup %1348 }
 0x486   :  { %404 = vrot.lane.b32.xlu1 %v1349_v55, %s1400_s12 }
 0x4f8   :  { %v405_v56 = vpop.permute.xlu1 %404 }
 0x4f9   :  { %v407_v57 = vmul.f32 %v1347_v43, %v405_v56  ;;  %v170_v43 = vadd.f32 %v1534_v13, %v1597_v62  ;;  %v175_v62 = vadd.f32 %v1595_v61, %v1534_v13 }
 0x4fb   :  { %411 = vrot.lane.b32.xlu0 %v407_v57, %s1401_s2 }
 0x56d   :  { %v412_v58 = vpop.permute.xlu0 %411 }
 0x56e   :  { %1261 = vmatmul.mubr.msk.f32.vlgmr.msra.gmra.mxu0 %vm37_vm2, %v412_v58 }
 0x56f   :  { %1275 = vmatpush3.msra.mxu0 %v1465_v2  ;;  %1282 = vmatprep.mubr.msk.f32.mxu0 %vm1399_vm1, %v1398_v1 }
 0x570   :  { %1276 = vmatprep.subr.mxu0 %v1398_v1 }
 0x571   :  { %1277 = vmatpush3.msra.mxu0 %v1479_v5 }
 0x572   :  { %1278 = vmatprep.subr.mxu0 %v1398_v1 }
 0x573   :  { %1279 = vmatpush3.msra.mxu0 %v1492_v8 }
 0x574   :  { %1280 = vmatprep.subr.mxu0 %v1398_v1 }
 0x575   :  { %1281 = vmatpush3.msra.mxu0 %v1501_v9 }
 0x576   :  { %1296 = vmatprep.subr.mxu0 %v1398_v1 }
 0x62e   :  { %v481_v4 = vpop.f32.mrf.mxu0 }
 0x62f   :  { %v485_v6 = vadd.f32 %v481_v4, %v160_v3 }
 0x630   :  { %v1262_v7 = vpop.f32.mrf.mxu0 }
 0x631   :  { %1350 = vtanh.f32 %v485_v6  ;;  %v1146_v11 = vmul.f32 -1.442695, %v485_v6 }
 0x633   :  { %1352 = vpow2.f32 %v1146_v11 }
 0x63e   :  { %v1351_v10 = vpop.eup %1350 }
 0x63f   :  { %495 = vrot.lane.b32.xlu1 %v1351_v10, %s1400_s12 }
 0x640   :  { %v1353_v12 = vpop.eup %1352 }
 0x641   :  { %v489_v14 = vadd.f32 1.0, %v1353_v12 }
 0x643   :  { %1354 = vrcp.f32 %v489_v14 }
 0x650   :  { %v1355_v15 = vpop.eup %1354 }
 0x651   :  { %v493_v18 = vmul.f32 %v1355_v15, %v401_v48 }
 0x6b1   :  { %v496_v16 = vpop.permute.xlu1 %495 }
 0x6b2   :  { %v498_v17 = vmul.f32 %v1355_v15, %v496_v16 }
 0x6b4   :  { %500 = vrot.lane.b32.xlu0 %v498_v17, %s1400_s12 }
 0x726   :  { %v501_v19 = vpop.permute.xlu0 %500 }
 0x727   :  { %v503_v20 = vadd.f32 %v501_v19, %v493_v18  ;;  %v180_v19 = vadd.f32 %v1534_v13, %v1601_v0 }
 0x729   :  { %1356 = vtanh.f32 %v503_v20 }
 0x736   :  { %v1357_v21 = vpop.eup %1356 }
 0x737   :  { %506 = vrot.lane.b32.xlu1 %v1357_v21, %s1400_s12 }
 0x7a9   :  { %v507_v22 = vpop.permute.xlu1 %506 }
 0x7aa   :  { %v509_v23 = vmul.f32 %v1355_v15, %v507_v22 }
 0x7ac   :  { %513 = vrot.lane.b32.xlu0 %v509_v23, %s1401_s2 }
 0x81e   :  { %v514_v24 = vpop.permute.xlu0 %513 }
 0x81f   :  { %1272 = vmatmul.mubr.msk.f32.vlgmr.msra.gmra.mxu1 %vm37_vm2, %v514_v24 }
 0x820   :  { %1286 = vmatpush3.msra.mxu1 %v1465_v2  ;;  %1293 = vmatprep.mubr.msk.f32.mxu1 %vm1399_vm1, %v1398_v1 }
 0x821   :  { %1287 = vmatprep.subr.mxu1 %v1398_v1 }
 0x822   :  { %1288 = vmatpush3.msra.mxu1 %v1479_v5 }
 0x823   :  { %1289 = vmatprep.subr.mxu1 %v1398_v1 }
 0x824   :  { %1290 = vmatpush3.msra.mxu1 %v1492_v8 }
 0x825   :  { %1291 = vmatprep.subr.mxu1 %v1398_v1 }
 0x826   :  { %1292 = vmatpush3.msra.mxu1 %v1501_v9 }
 0x827   :  { %1307 = vmatprep.subr.mxu1 %v1398_v1 }
 0x8df   :  { %v583_v26 = vpop.f32.mrf.mxu1 }
 0x8e0   :  { %v587_v27 = vadd.f32 %v583_v26, %v165_v25 }
 0x8e1   :  { %v1273_v28 = vpop.f32.mrf.mxu1 }
 0x8e2   :  { %1358 = vtanh.f32 %v587_v27  ;;  %v1148_v30 = vmul.f32 -1.442695, %v587_v27 }
 0x8e4   :  { %1360 = vpow2.f32 %v1148_v30 }
 0x8ef   :  { %v1359_v29 = vpop.eup %1358 }
 0x8f0   :  { %597 = vrot.lane.b32.xlu1 %v1359_v29, %s1400_s12 }
 0x8f1   :  { %v1361_v31 = vpop.eup %1360 }
 0x8f2   :  { %v591_v32 = vadd.f32 1.0, %v1361_v31 }
 0x8f4   :  { %1362 = vrcp.f32 %v591_v32 }
 0x901   :  { %v1363_v33 = vpop.eup %1362 }
 0x902   :  { %v595_v36 = vmul.f32 %v1363_v33, %v503_v20 }
 0x962   :  { %v598_v34 = vpop.permute.xlu1 %597 }
 0x963   :  { %v600_v35 = vmul.f32 %v1363_v33, %v598_v34 }
 0x965   :  { %602 = vrot.lane.b32.xlu0 %v600_v35, %s1400_s12 }
 0x9d7   :  { %v603_v37 = vpop.permute.xlu0 %602 }
 0x9d8   :  { %v605_v38 = vadd.f32 %v603_v37, %v595_v36  ;;  %v185_v36 = vadd.f32 %v1599_v63, %v1534_v13  ;;  %v1038_v63 = vld [vmem:[%s1711_s6 + $0x18] sm:$0xff] }
 0x9da   :  { %1364 = vtanh.f32 %v605_v38 }
 0x9e7   :  { %v1365_v39 = vpop.eup %1364 }
 0x9e8   :  { %608 = vrot.lane.b32.xlu1 %v1365_v39, %s1400_s12 }
 0xa5a   :  { %v609_v40 = vpop.permute.xlu1 %608 }
 0xa5b   :  { %v611_v41 = vmul.f32 %v1363_v33, %v609_v40 }
 0xa5d   :  { %615 = vrot.lane.b32.xlu0 %v611_v41, %s1401_s2 }
 0xacf   :  { %v616_v42 = vpop.permute.xlu0 %615 }
 0xad0   :  { %1283 = vmatmul.mubr.msk.f32.vlgmr.msra.gmra.mxu0 %vm37_vm2, %v616_v42 }
 0xad1   :  { %1297 = vmatpush3.msra.mxu0 %v1465_v2  ;;  %1304 = vmatprep.mubr.msk.f32.mxu0 %vm1399_vm1, %v1398_v1 }
 0xad2   :  { %1298 = vmatprep.subr.mxu0 %v1398_v1 }
 0xad3   :  { %1299 = vmatpush3.msra.mxu0 %v1479_v5 }
 0xad4   :  { %1300 = vmatprep.subr.mxu0 %v1398_v1 }
 0xad5   :  { %1301 = vmatpush3.msra.mxu0 %v1492_v8 }
 0xad6   :  { %1302 = vmatprep.subr.mxu0 %v1398_v1 }
 0xad7   :  { %1303 = vmatpush3.msra.mxu0 %v1501_v9 }
 0xad8   :  { %1318 = vmatprep.subr.mxu0 %v1398_v1 }
 0xb90   :  { %v685_v44 = vpop.f32.mrf.mxu0 }
 0xb91   :  { %v689_v45 = vadd.f32 %v685_v44, %v170_v43 }
 0xb92   :  { %v1284_v46 = vpop.f32.mrf.mxu0 }
 0xb93   :  { %1366 = vtanh.f32 %v689_v45  ;;  %v1150_v48 = vmul.f32 -1.442695, %v689_v45 }
 0xb95   :  { %1368 = vpow2.f32 %v1150_v48 }
 0xba0   :  { %v1367_v47 = vpop.eup %1366 }
 0xba1   :  { %699 = vrot.lane.b32.xlu1 %v1367_v47, %s1400_s12 }
 0xba2   :  { %v1369_v49 = vpop.eup %1368 }
 0xba3   :  { %v693_v50 = vadd.f32 1.0, %v1369_v49  ;;  %v1037_v49 = vld [vmem:[%s1711_s6 + $0x10] sm:$0xff] }
 0xba5   :  { %1370 = vrcp.f32 %v693_v50  ;;  %v1036_v50 = vld [vmem:[%s1711_s6 + $0x8] sm:$0xff] }
 0xbb2   :  { %v1371_v51 = vpop.eup %1370 }
 0xbb3   :  { %v697_v54 = vmul.f32 %v1371_v51, %v605_v38 }
 0xc13   :  { %v700_v52 = vpop.permute.xlu1 %699 }
 0xc14   :  { %v702_v53 = vmul.f32 %v1371_v51, %v700_v52 }
 0xc16   :  { %704 = vrot.lane.b32.xlu0 %v702_v53, %s1400_s12 }
 0xc88   :  { %v705_v55 = vpop.permute.xlu0 %704 }
 0xc89   :  { %v707_v56 = vadd.f32 %v705_v55, %v697_v54 }
 0xc8b   :  { %1372 = vtanh.f32 %v707_v56 }
 0xc98   :  { %v1373_v57 = vpop.eup %1372 }
 0xc99   :  { %710 = vrot.lane.b32.xlu1 %v1373_v57, %s1400_s12 }
 0xd0b   :  { %v711_v58 = vpop.permute.xlu1 %710 }
 0xd0c   :  { %v713_v59 = vmul.f32 %v1371_v51, %v711_v58  ;;  %v1035_v51 = vld [vmem:[%s1711_s6] sm:$0xff] }
 0xd0e   :  { %717 = vrot.lane.b32.xlu0 %v713_v59, %s1401_s2 }
 0xd80   :  { %v718_v60 = vpop.permute.xlu0 %717 }
 0xd81   :  { %1294 = vmatmul.mubr.msk.f32.vlgmr.msra.gmra.mxu1 %vm37_vm2, %v718_v60 }
 0xd82   :  { %1308 = vmatpush3.msra.mxu1 %v1465_v2  ;;  %1315 = vmatprep.mubr.msk.f32.mxu1 %vm1399_vm1, %v1398_v1 }
 0xd83   :  { %1309 = vmatprep.subr.mxu1 %v1398_v1 }
 0xd84   :  { %1310 = vmatpush3.msra.mxu1 %v1479_v5 }
 0xd85   :  { %1311 = vmatprep.subr.mxu1 %v1398_v1 }
 0xd86   :  { %1312 = vmatpush3.msra.mxu1 %v1492_v8 }
 0xd87   :  { %1313 = vmatprep.subr.mxu1 %v1398_v1 }
 0xd88   :  { %1314 = vmatpush3.msra.mxu1 %v1501_v9 }
 0xe41   :  { %v787_v3 = vpop.f32.mrf.mxu1 }
 0xe42   :  { %v791_v2 = vadd.f32 %v787_v3, %v175_v62 }
 0xe43   :  { %v1295_v4 = vpop.f32.mrf.mxu1 }
 0xe44   :  { %1374 = vtanh.f32 %v791_v2  ;;  %v1152_v7 = vmul.f32 -1.442695, %v791_v2 }
 0xe46   :  { %1376 = vpow2.f32 %v1152_v7 }
 0xe51   :  { %v1375_v6 = vpop.eup %1374 }
 0xe52   :  { %801 = vrot.lane.b32.xlu1 %v1375_v6, %s1400_s12 }
 0xe53   :  { %v1377_v5 = vpop.eup %1376 }
 0xe54   :  { %v795_v10 = vadd.f32 1.0, %v1377_v5 }
 0xe56   :  { %1378 = vrcp.f32 %v795_v10 }
 0xe63   :  { %v1379_v8 = vpop.eup %1378 }
 0xe64   :  { %v799_v9 = vmul.f32 %v1379_v8, %v707_v56 }
 0xec4   :  { %v802_v11 = vpop.permute.xlu1 %801 }
 0xec5   :  { %v804_v12 = vmul.f32 %v1379_v8, %v802_v11 }
 0xec7   :  { %806 = vrot.lane.b32.xlu0 %v804_v12, %s1400_s12 }
 0xf39   :  { %v807_v14 = vpop.permute.xlu0 %806 }
 0xf3a   :  { %v809_v61 = vadd.f32 %v807_v14, %v799_v9 }
 0xf3c   :  { %1380 = vtanh.f32 %v809_v61 }
 0xf49   :  { %v1381_v15 = vpop.eup %1380 }
 0xf4a   :  { %812 = vrot.lane.b32.xlu1 %v1381_v15, %s1400_s12 }
 0xfbc   :  { %v813_v16 = vpop.permute.xlu1 %812 }
 0xfbd   :  { %v815_v17 = vmul.f32 %v1379_v8, %v813_v16 }
 0xfbf   :  { %819 = vrot.lane.b32.xlu0 %v815_v17, %s1401_s2 }
0x1031   :  { %v820_v18 = vpop.permute.xlu0 %819 }
0x1032   :  { %1305 = vmatmul.mubr.msk.f32.vlgmr.msra.gmra.mxu0 %vm37_vm2, %v820_v18 }
0x1033   :  { %1326 = vmatprep.mubr.msk.f32.mxu0 %vm1399_vm1, %v1398_v1  ;;  %1319 = vmatpush3.msra.mxu0 %v1038_v63 }
0x1034   :  { %1320 = vmatprep.subr.mxu0 %v1398_v1 }
0x1035   :  { %1321 = vmatpush3.msra.mxu0 %v1037_v49 }
0x1036   :  { %1322 = vmatprep.subr.mxu0 %v1398_v1 }
0x1037   :  { %1323 = vmatpush3.msra.mxu0 %v1036_v50 }
0x1038   :  { %1324 = vmatprep.subr.mxu0 %v1398_v1  ;;  %v1157_v1 = vld [vmem:[%s1714_s7] ss:$0 sm:$0xff] }
0x1039   :  { %1325 = vmatpush3.msra.mxu0 %v1035_v51 }
0x10f2   :  { %v889_v20 = vpop.f32.mrf.mxu0 }
0x10f3   :  { %v893_v21 = vadd.f32 %v889_v20, %v180_v19 }
0x10f4   :  { %v1306_v22 = vpop.f32.mrf.mxu0 }
0x10f5   :  { %1382 = vtanh.f32 %v893_v21  ;;  %v1154_v24 = vmul.f32 -1.442695, %v893_v21 }
0x10f7   :  { %1384 = vpow2.f32 %v1154_v24 }
0x1102   :  { %v1383_v23 = vpop.eup %1382 }
0x1103   :  { %903 = vrot.lane.b32.xlu1 %v1383_v23, %s1400_s12 }
0x1104   :  { %v1385_v25 = vpop.eup %1384 }
0x1105   :  { %v897_v26 = vadd.f32 1.0, %v1385_v25 }
0x1107   :  { %1386 = vrcp.f32 %v897_v26 }
0x1114   :  { %v1387_v27 = vpop.eup %1386 }
0x1115   :  { %v901_v30 = vmul.f32 %v1387_v27, %v809_v61 }
0x1175   :  { %v904_v28 = vpop.permute.xlu1 %903 }
0x1176   :  { %v906_v29 = vmul.f32 %v1387_v27, %v904_v28 }
0x1178   :  { %908 = vrot.lane.b32.xlu0 %v906_v29, %s1400_s12 }
0x11ea   :  { %v909_v31 = vpop.permute.xlu0 %908 }
0x11eb   :  { %v911_v0 = vadd.f32 %v909_v31, %v901_v30 }
0x11ed   :  { %1388 = vtanh.f32 %v911_v0 }
0x11fa   :  { %v1389_v32 = vpop.eup %1388 }
0x11fb   :  { %914 = vrot.lane.b32.xlu1 %v1389_v32, %s1400_s12 }
0x126d   :  { %v915_v33 = vpop.permute.xlu1 %914 }
0x126e   :  { %v917_v34 = vmul.f32 %v1387_v27, %v915_v33 }
0x1270   :  { %921 = vrot.lane.b32.xlu0 %v917_v34, %s1401_s2 }
0x12e2   :  { %v922_v35 = vpop.permute.xlu0 %921 }
0x12e3   :  { %1316 = vmatmul.mubr.msk.f32.vlgmr.msra.gmra.mxu1 %vm37_vm2, %v922_v35 }
0x13a3   :  { %v991_v37 = vpop.f32.mrf.mxu1 }
0x13a4   :  { %v995_v38 = vadd.f32 %v991_v37, %v185_v36 }
0x13a5   :  { %v1317_v39 = vpop.f32.mrf.mxu1 }
0x13a6   :  { %1390 = vtanh.f32 %v995_v38  ;;  %v1156_v41 = vmul.f32 -1.442695, %v995_v38 }
0x13a8   :  { %1392 = vpow2.f32 %v1156_v41 }
0x13b3   :  { %v1391_v40 = vpop.eup %1390 }
0x13b4   :  { %1005 = vrot.lane.b32.xlu1 %v1391_v40, %s1400_s12 }
0x13b5   :  { %v1393_v42 = vpop.eup %1392 }
0x13b6   :  { %v999_v43 = vadd.f32 1.0, %v1393_v42 }
0x13b8   :  { %1394 = vrcp.f32 %v999_v43 }
0x13c5   :  { %v1395_v44 = vpop.eup %1394 }
0x13c6   :  { %v1003_v47 = vmul.f32 %v1395_v44, %v911_v0 }
0x1426   :  { %v1006_v45 = vpop.permute.xlu1 %1005 }
0x1427   :  { %v1008_v46 = vmul.f32 %v1395_v44, %v1006_v45 }
0x1429   :  { %1010 = vrot.lane.b32.xlu0 %v1008_v46, %s1400_s12 }
0x149b   :  { %v1011_v48 = vpop.permute.xlu0 %1010 }
0x149c   :  { %v1013_v13 = vadd.f32 %v1011_v48, %v1003_v47 }
0x149e   :  { %1396 = vtanh.f32 %v1013_v13 }
0x14ab   :  { %v1397_v52 = vpop.eup %1396 }
0x14ac   :  { %1016 = vrot.lane.b32.xlu1 %v1397_v52, %s1400_s12 }
0x14b0   :  { %1026 = vrot.lane.b32.xlu1 %v1013_v13, %s1402_s1 }
0x151e   :  { %v1017_v53 = vpop.permute.xlu1 %1016 }
0x151f   :  { %v1019_v54 = vmul.f32 %v1395_v44, %v1017_v53 }
0x1521   :  { %1021 = vrot.lane.b32.xlu0 %v1019_v54, %s1401_s2 }
0x1522   :  { %v1027_v55 = vpop.permute.xlu1 %1026 }
0x1523   :  { %1029 = vst.msk [vmem:[#allocation3] sm:$0xff] %vm37_vm2, %v1027_v55  ;;  %1034 = vst.msk [vmem:[%s1712_s10] sm:$0xff] %vm37_vm2, %v1027_v55 }
0x1593   :  { %v1022_v56 = vpop.permute.xlu0 %1021 }
0x1594   :  { %1024 = vst.msk [vmem:[#allocation2] sm:$0xff] %vm37_vm2, %v1022_v56  ;;  %1033 = vst.msk [vmem:[%s1713_s9] sm:$0xff] %vm37_vm2, %v1022_v56  ;;  %1327 = vmatmul.mubr.msk.f32.vlgmr.msra.gmra.mxu0 %vm37_vm2, %v1022_v56 }
0x1654   :  { %v1114_v57 = vpop.f32.mrf.mxu0 }
0x1655   :  { %v1115_v58 = vadd.f32 %v1157_v1, %v1114_v57 }
0x1656   :  { %v1328_v59 = vpop.f32.mrf.mxu0 }
0x1657   :  { %1119 = vst.msk [vmem:[%s1715_s8] sm:$0xff] %vm1118_vm3, %v1115_v58 }

</bundles_post_ra>
